<compile_context>
chip_gen: v7x
topology: tpu7x:2x2x1
jax: 0.10.0
libtpu: 0.0.40
codegen_flags: <defaults>
</compile_context>

<pallas_src>
import jax
import jax.numpy as jnp
from jax.experimental import pallas as pl
from jax.experimental.pallas import tpu as pltpu


def _round_up(x, m):
    return ((x + m - 1) // m) * m


def _noise_kernel(x_ref, w_ref, n_ref, o_ref):
    # VPU elementwise: out = x + weight * noise
    # x: (1, tC, tT), w: (1, tC, 1), n: (1, 1, tT) -> broadcast to (1, tC, tT)
    o_ref[...] = x_ref[...] + w_ref[...] * n_ref[...]


# Below this many (C*T) elements per batch, plain XLA fusion beats a Pallas
# launch (per-grid-step overhead ~0.35us dwarfs the work).
_SMALL_FASTPATH_ELEMS = 1 << 15


def noise_layer(
    x,
    weight,
    noise=None,
    *,
    use_noise=True,
    key=None,
    use_pallas=None,
    block_c=None,
    block_t=None,
    donate_x=False,
):
    """Pallas implementation of NoiseLayer.forward.

    x:      (B, C, T)
    weight: (C,)
    noise:  optional (B, 1, T); if None, sampled from `key` like torch.randn.
    """
    if not use_noise:
        return x

    B, C, T = x.shape
    if noise is None:
        if key is None:
            # A silent fixed default key would repeat the "random" noise on every
            # call (unlike torch.randn); force the caller to be explicit.
            raise ValueError(
                "noise_layer: pass `noise` explicitly or supply a PRNG `key`."
            )
        noise = jax.random.normal(key, (B, 1, T), dtype=x.dtype)
    noise = noise.astype(x.dtype)
    weight = weight.astype(x.dtype)

    if use_pallas is None:
        use_pallas = (C * T) >= _SMALL_FASTPATH_ELEMS
    if not use_pallas:
        # Tiny-shape fast path: XLA fuses this elementwise op optimally.
        return x + weight.reshape(1, C, 1) * noise

    # ---------------- tile selection ----------------
    # T tiles: lane-dense (multiple of 128), target 512-1024 lanes.
    if block_t is None:
        t128 = _round_up(T, 128)
        block_t = t128 if t128 <= 1024 else 512
    block_t = max(128, _round_up(block_t, 128))
    # C tiles: sublane-aligned (multiple of 8), capped at 256 rows.
    if block_c is None:
        block_c = min(_round_up(C, 8), 256)
    block_c = max(8, _round_up(block_c, 8))

    C_pad = _round_up(C, block_c)
    T_pad = _round_up(T, block_t)
    padded = (C_pad != C) or (T_pad != T)

    if padded:
        x_p = jnp.pad(x, ((0, 0), (0, C_pad - C), (0, T_pad - T)))
        n_p = jnp.pad(noise, ((0, 0), (0, 0), (0, T_pad - T)))
        w_p = jnp.pad(weight, (0, C_pad - C))
    else:
        x_p, n_p, w_p = x, noise, weight
    w3 = w_p.reshape(1, C_pad, 1)

    # C-tile axis innermost: the noise block index (b, 0, tj) is independent of
    # ci, so Pallas keeps the noise tile resident across all C tiles.
    grid = (B, T_pad // block_t, C_pad // block_c)

    extra_kwargs = {}
    if donate_x and not padded:
        # Optional: reuse x's HBM buffer for the output when the caller donates it.
        extra_kwargs["input_output_aliases"] = {0: 0}

    out = pl.pallas_call(
        _noise_kernel,
        out_shape=jax.ShapeDtypeStruct((B, C_pad, T_pad), x.dtype),
        grid_spec=pltpu.PrefetchScalarGridSpec(
            num_scalar_prefetch=0,
            grid=grid,
            in_specs=[
                # x: one (1, tC, tT) tile per grid step.
                pl.BlockSpec((1, block_c, block_t), lambda b, tj, ci: (b, ci, tj)),
                # weight: (1, tC, 1); block index only depends on ci.
                pl.BlockSpec((1, block_c, 1), lambda b, tj, ci: (0, ci, 0)),
                # noise: (1, 1, tT); independent of ci -> no re-DMA across C tiles.
                pl.BlockSpec((1, 1, block_t), lambda b, tj, ci: (b, 0, tj)),
            ],
            out_specs=pl.BlockSpec(
                (1, block_c, block_t), lambda b, tj, ci: (b, ci, tj)
            ),
        ),
        compiler_params=pltpu.CompilerParams(
            # B and T tiles can shard across TensorCores (v7x has 2 TCs/chip);
            # C innermost stays sequential so the noise-tile reuse kicks in.
            dimension_semantics=("parallel", "parallel", "arbitrary"),
            # Tiles are ~1 MiB each; 32 MiB is ample headroom on v5e/v6e and
            # safely under v7x's 64 MiB physical VMEM.
            vmem_limit_bytes=32 * 1024 * 1024,
        ),
        **extra_kwargs,
    )(x_p, w3, n_p)

    if padded:
        out = out[:, :C, :T]
    return out


# TODO(synk): optional in-kernel RNG (pltpu.prng_seed + stateful_normal) could
# drop the separate (B,1,T) noise array entirely; kept external for parity with
# the PyTorch module's explicit-noise path.


if __name__ == "__main__":
    key = jax.random.PRNGKey(0)
    kx, kn, kw, kx2, kn2, kw2 = jax.random.split(key, 6)

    # --- small shapes consistent with the module (B, C, T) ---
    B, C, T = 2, 4, 16
    x = jax.random.normal(kx, (B, C, T), dtype=jnp.float32)
    noise = jax.random.normal(kn, (B, 1, T), dtype=jnp.float32)
    # nn.Parameter(torch.zeros(channels)) is zero-init; use a nonzero weight so
    # the noise path is actually exercised numerically.
    weight = jax.random.normal(kw, (C,), dtype=jnp.float32) * 0.1

    ref = x + weight.reshape(1, C, 1) * noise

    # 1) Auto path (tiny shape -> fused-XLA fast path).
    out_fast = jax.block_until_ready(noise_layer(x, weight, noise=noise))
    assert jnp.allclose(out_fast, ref, atol=1e-6), "fast-path mismatch"

    # 2) Force the Pallas kernel on the same small shape (exercises padding to
    #    lane-dense tiles: C 4->8, T 16->128).
    out_pallas = jax.block_until_ready(
        noise_layer(x, weight, noise=noise, use_pallas=True)
    )
    assert jnp.allclose(out_pallas, ref, atol=1e-6), "pallas small-shape mismatch"

    # 3) Multi-tile Pallas path: grid (B, T_tiles, C_tiles) = (2, 4, 3),
    #    checks the tiled index_maps and the noise-reuse-across-C-tiles layout.
    B2, C2, T2 = 2, 24, 512
    x2 = jax.random.normal(kx2, (B2, C2, T2), dtype=jnp.float32)
    noise2 = jax.random.normal(kn2, (B2, 1, T2), dtype=jnp.float32)
    weight2 = jax.random.normal(kw2, (C2,), dtype=jnp.float32) * 0.1
    out2 = jax.block_until_ready(
        noise_layer(
            x2, weight2, noise=noise2, use_pallas=True, block_c=8, block_t=128
        )
    )
    ref2 = x2 + weight2.reshape(1, C2, 1) * noise2
    assert jnp.allclose(out2, ref2, atol=1e-6), "pallas tiled mismatch"

    # 4) use_noise=False returns x untouched.
    out_no = jax.block_until_ready(noise_layer(x, weight, use_noise=False))
    assert jnp.array_equal(out_no, x)

    print("KERNEL_OK")
</pallas_src>

<mosaic_0001>
module attributes {stable_mosaic.version = 11 : i64} {
  func.func @_noise_kernel(%arg0: i32, %arg1: i32, %arg2: i32, %arg3: memref<1x8x128xf32, #tpu.memory_space<vmem>>, %arg4: memref<1x8x1xf32, #tpu.memory_space<vmem>>, %arg5: memref<1x1x128xf32, #tpu.memory_space<vmem>>, %arg6: memref<1x8x128xf32, #tpu.memory_space<vmem>>) attributes {dimension_semantics = [#tpu.dimension_semantics<parallel>, #tpu.dimension_semantics<parallel>, #tpu.dimension_semantics<arbitrary>], iteration_bounds = array<i64: 2, 1, 1>, scalar_prefetch = 0 : i64, scratch_operands = 0 : i64, tpu.core_type = #tpu.core_type<tc>, window_params = [{transform_indices = @transform_0, window_bounds = array<i64: 1, 8, 128>}, {transform_indices = @transform_1, window_bounds = array<i64: 1, 8, 1>}, {transform_indices = @transform_2, window_bounds = array<i64: 1, 1, 128>}, {transform_indices = @transform_3, window_bounds = array<i64: 1, 8, 128>}]} {
    %c0 = arith.constant 0 : index
    %c0_0 = arith.constant 0 : index
    %c0_1 = arith.constant 0 : index
    %0 = vector.load %arg3[%c0, %c0_0, %c0_1] : memref<1x8x128xf32, #tpu.memory_space<vmem>>, vector<1x8x128xf32>
    %c0_2 = arith.constant 0 : index
    %c0_3 = arith.constant 0 : index
    %c0_4 = arith.constant 0 : index
    %1 = vector.load %arg4[%c0_2, %c0_3, %c0_4] : memref<1x8x1xf32, #tpu.memory_space<vmem>>, vector<1x8x1xf32>
    %c0_5 = arith.constant 0 : index
    %c0_6 = arith.constant 0 : index
    %c0_7 = arith.constant 0 : index
    %2 = vector.load %arg5[%c0_5, %c0_6, %c0_7] : memref<1x1x128xf32, #tpu.memory_space<vmem>>, vector<1x1x128xf32>
    %3 = vector.broadcast %1 : vector<1x8x1xf32> to vector<1x8x128xf32>
    %4 = vector.broadcast %2 : vector<1x1x128xf32> to vector<1x8x128xf32>
    %5 = arith.mulf %3, %4 : vector<1x8x128xf32>
    %6 = arith.addf %0, %5 : vector<1x8x128xf32>
    %c0_8 = arith.constant 0 : index
    %c0_9 = arith.constant 0 : index
    %c0_10 = arith.constant 0 : index
    %7 = vector.load %arg6[%c0_8, %c0_9, %c0_10] : memref<1x8x128xf32, #tpu.memory_space<vmem>>, vector<1x8x128xf32>
    tpu.vector_store %arg6[%c0_8, %c0_9, %c0_10], %6 {strides = array<i32>} : memref<1x8x128xf32, #tpu.memory_space<vmem>>, vector<1x8x128xf32>,
    return
  }
  func.func @transform_0(%arg0: i32, %arg1: i32, %arg2: i32) -> (i32, i32, i32) {
    %c0_i32 = arith.constant 0 : i32
    return %arg0, %arg2, %arg1 : i32, i32, i32
  }
  func.func @transform_1(%arg0: i32, %arg1: i32, %arg2: i32) -> (i32, i32, i32) {
    %c0_i32 = arith.constant 0 : i32
    %c0_i32_0 = arith.constant 0 : i32
    %c0_i32_1 = arith.constant 0 : i32
    return %c0_i32, %arg2, %c0_i32_0 : i32, i32, i32
  }
  func.func @transform_2(%arg0: i32, %arg1: i32, %arg2: i32) -> (i32, i32, i32) {
    %c0_i32 = arith.constant 0 : i32
    %c0_i32_0 = arith.constant 0 : i32
    return %arg0, %c0_i32, %arg1 : i32, i32, i32
  }
  func.func @transform_3(%arg0: i32, %arg1: i32, %arg2: i32) -> (i32, i32, i32) {
    %c0_i32 = arith.constant 0 : i32
    return %arg0, %arg2, %arg1 : i32, i32, i32
  }
}

</mosaic_0001>

<bundles_post_ra>
// kernel: tpu_custom_call.1
= control target key start
LH: loop header
LB: loop body
LE: loop exit
PB: predicated region body
PF: predicated region fallthrough
CT: control target
= control target key end

     0   :  { %8 = vsyncpa [#allocation3], 0  ;;  %s798_s0 = inlined_call_operand.hbm [shape: f32[2,8,128], index: 0, kind: input, shape index: {}]   ;;  %s799_s1 = inlined_call_operand.vmem [shape: f32[1,8,1], index: 1, kind: input, shape index: {}]   ;;  %s800_s2 = inlined_call_operand.vmem [shape: f32[2,1,128], index: 2, kind: input, shape index: {}]   ;;  %s801_s3 = inlined_call_operand.hbm [shape: f32[2,8,128], index: 3, kind: output, shape index: {}]  }
   0x1   :  { %10 = vsyncpa [#allocation3 + $0x1], 0 }
   0x2   :  { %11 = vsyncpa [#allocation4], 0 }
   0x3   :  { %13 = vsyncpa [#allocation4 + $0x1], 0  ;;  %s618_s12 = smov 0   ;;  %s620_s13 = smov 0  }
   0x4   :  { %s622_s14 = smov 0   ;;  %s624_s15 = smov 0  }
   0x5   :  { %s626_s16 = smov 0   ;;  %s628_s17 = smov 0  }
   0x6 LB: > { %s402_s18 = sadd.s32 4294967295, %s593_s17   ;;  %s403_s19 = sadd.s32 4294967294, %s593_s17   ;;  %s593_s17 = sphi %s628_s17, %s19_s17   ;;  %s589_s16 = sphi %s626_s16, %s817_s16   ;;  %s585_s15 = sphi %s624_s15, %s816_s15   ;;  %s581_s14 = sphi %s622_s14, %s815_s14   ;;  %s577_s13 = sphi %s620_s13, %s814_s13   ;;  %s573_s12 = sphi %s618_s12, %s813_s12  }
   0x7   : > { %s38_s20 = sadd.s32 1, %s589_s16  ;;  %s49_s21 = sadd.s32 1, %s581_s14 }
   0x8   : > { %p40_p0 = scmp.ge.s32.totalorder %s38_s20, 2  ;;  %p56_p1 = scmp.ne.s32.totalorder %s581_s14, %s577_s13 }
   0x9   : > { %p57_p2 = scmp.eq.s32.totalorder %s593_s17, 0  ;;  %p62_p3 = scmp.ne.s32.totalorder %s577_s13, %s573_s12 }
   0xa   : > { %s819_s20 = smov (%p40_p0, %s38_s20), 0  ;;  %p63_p5 = scmp.eq.s32.totalorder %s402_s18, 0 }
   0xb   : > { %p659_p4 = por %p57_p2, %p56_p1  ;;  %s42_s23 = ssub.s32 %s589_s16, %s819_s20 }
   0xc   : > { %p144_p6 = scmp.eq.s32.totalorder %s402_s18, 1  ;;  %p47_p7 = scmp.eq.s32.totalorder %s42_s23, 0 }
   0xd   : > { %p665_p8 = por %p63_p5, %p62_p3  ;;  %p150_p10 = scmp.eq.s32.totalorder %s403_s19, 1 }
   0xe   : > { %p669_p9 = por %p144_p6, %p56_p1  ;;  %p429_p13 = scmp.lt.s32.totalorder %s593_s17, 2 }
   0xf   : > { %s674_s26 = scalar_select %p47_p7, %s581_s14, %s49_s21  }
  0x10   : > { %s805_s25 = scalar_select %p669_p9, 1, 0 }
  0x11   : > { %p676_p11 = por %p150_p10, %p62_p3  ;;  %s177_s28 = sand.u32 1, %s581_s14  }
  0x12   : > { %s407_s29 = sshll.u32 %s177_s28, 3  ;;  %s408_s30 = sshll.u32 %s589_s16, 7 }
  0x13   : > { %s806_s27 = scalar_select %p676_p11, 1, 0 }
  0x14   : > { %s687_s6 = scalar_lea.hbm %s798_s0, %s408_s30  ;;  %s181_s7 = scalar_lea.vmem [#allocation2], %s407_s29 }
  0x15   : > { %s190_s8 = sshll.u32 %s181_s7, 4  ;;  %p693_p0 = pnand %p429_p13, %p659_p4  ;;  %s689_s8 = int_to_ptr.vmem [resolvable:$true] %s190_s8 }
  0x16   : > { %s178_s10 = scalar_lea.sflag [#allocation3], %s177_s28  ;;  %s481_s11 = scalar_lea.hbm %s687_s6, 128 }
  0x17   : > { %p482_p3 = scmp.ne.s32.totalorder %s687_s6, %s481_s11  ;;  %p483_p5 = pneg %p693_p0 }
  0x18   : > { %s486_s21 = scalar_lea.hbm %s798_s0, 256  ;;  %p487_p4 = scmp.lt.u32.totalorder %s687_s6, %s798_s0 }
  0x19   : > { %p484_p6 = pnand %p483_p5, %p482_p3  ;;  %p488_p10 = scmp.lt.u32.totalorder %s486_s21, %s481_s11 }
  0x1a   : > { %p490_p12 = scmp.lt.u32.totalorder %s481_s11, %s687_s6 }
  0x1b   : > { %p485_p7 = pneg %p484_p6  ;;  %p489_p13 = por %p488_p10, %p487_p4 }
  0x1d   : > { %p491_p1 = por %p490_p12, %p489_p13 }
  0x1f   : > { %p492_p2 = pnand %p491_p1, %p485_p7 }
  0x21   : > { %495 = shalt.err (!%p492_p2)
}
  0x22   : > { %s496_s28 = scalar_lea.vmem %s689_s8, 128  ;;  %s595_s29 = smov [#allocation2]  }
  0x23   : > { %p497_p3 = scmp.ne.s32.totalorder %s689_s8, %s496_s28  ;;  %s501_s30 = sshll.u32 %s595_s29, 4  ;;  %s502_s30 = int_to_ptr.vmem [resolvable:$false] %s501_s30 }
  0x24   : > { %s503_s4 = scalar_lea.vmem %s502_s30, 256  ;;  %p504_p9 = scmp.lt.s32.totalorder %s689_s8, %s502_s30 }
  0x25   : > { %p499_p6 = pnand %p497_p3, %p483_p5  ;;  %p505_p4 = scmp.lt.s32.totalorder %s503_s4, %s496_s28 }
  0x27   : > { %p500_p11 = pneg %p499_p6  ;;  %p506_p10 = por %p505_p4, %p504_p9 }
  0x29   : > { %p507_p12 = pnand %p506_p10, %p500_p11 }
  0x2b   : > { %510 = shalt.err (!%p507_p12)
}
  0x2c   : > { %424 = dma.hbm_to_vmem [thread:$0]  (!%p693_p0), %s687_s6, 128, %s689_s8, %s178_s10  }
  0x2d   : > { %p808_p1 = scmp.lt.s32.totalorder %s593_s17, 3  ;;  %p809_p2 = scmp.ge.s32.totalorder %s593_s17, 1 }
  0x2f   : > { %p205_p5 = pnand %p809_p2, %p808_p1 }
  0x30   : > { %s729_s5 = sand.u32 (!%p205_p5), 1, %s577_s13  }
  0x31   : > { %208 = sbr.rel (%p205_p5) target bundleno = 205 (0xcd), region = 32  ;;  %s410_s7 = sshll.u32 (!%p205_p5), %s729_s5, 3 }
  0x32   : > { %s211_s11 = scalar_lea.sflag (!%p205_p5), [#allocation3], %s729_s5  ;;  %s214_s18 = scalar_lea.vmem (!%p205_p5), [#allocation2], %s410_s7 }
  0x38   : > { %564 = dma.done.wait (%p665_p8), %s211_s11, 128  }
  0x39   : > { %566 = vsyncadd (%p665_p8), %s211_s11, 4294967168  ;;  %v596_v0 = vmov 0   ;;  %v258_v1 = vld [vmem:[%s799_s1] sm:$0xff]  ;;  %p251_p9 = scmp.lt.s32.totalorder %s585_s15, 1  ;;  %s414_s24 = sshll.u32 %s585_s15, 7 }
  0x3a   : > { %480 = vset.pattern.permute.xlu0 %v596_v0  ;;  %v257_v4 = vld [vmem:[%s214_s18] sm:$0xff]  ;;  %s246_s22 = scalar_lea.vmem [#allocation5], %s410_s7  ;;  %s749_s30 = scalar_lea.hbm %s801_s3, %s414_s24 }
  0x3b   : > { %262 = vperm.xlu0 %480, %v258_v1   ;;  %s252_s9 = scalar_select %p251_p9, %s585_s15, 1 }
  0x3c   : > { %s290_s23 = sshll.u32 %s246_s22, 4  ;;  %s275_s4 = scalar_lea.sflag [#allocation4], %s729_s5  ;;  %s751_s23 = int_to_ptr.vmem [resolvable:$true] %s290_s23 }
  0x3d   : > { %s256_s21 = scalar_lea.vmem %s800_s2, %s252_s9  ;;  %s511_s11 = scalar_lea.vmem %s751_s23, 128 }
  0x3e   : > { %v412_v2 = vld [vmem:[%s256_s21] ss:$0 sm:$0xff]  ;;  %p512_p8 = scmp.ne.s32.totalorder %s751_s23, %s511_s11  ;;  %p810_p11 = scmp.ne.s32.totalorder %s805_s25, 0 }
  0x3f   : > { %s597_s15 = smov [#allocation5]  }
  0x40   : > { %p513_p0 = pnand %p512_p8, %p810_p11  ;;  %s515_s7 = sshll.u32 %s597_s15, 4  ;;  %s516_s7 = int_to_ptr.vmem [resolvable:$false] %s515_s7 }
  0x41   : > { %s517_s18 = scalar_lea.vmem %s516_s7, 256  ;;  %p518_p13 = scmp.lt.s32.totalorder %s751_s23, %s516_s7 }
  0x42   : > { %p514_p7 = pneg %p513_p0  ;;  %p519_p3 = scmp.lt.s32.totalorder %s517_s18, %s511_s11 }
  0x44   : > { %p520_p6 = por %p519_p3, %p518_p13 }
  0x46   : > { %p521_p4 = pnand %p520_p6, %p514_p7 }
  0xba   : > { %v263_v3 = vpop.permute.xlu0 %262 }
  0xbb   : > { %v271_v5 = vmul.f32 %v412_v2, %v263_v3 }
  0xbd   : > { %v272_v6 = vadd.f32 %v271_v5, %v257_v4 }
  0xbf   : > { %273 = vst [vmem:[%s246_s22] sm:$0xff] %v272_v6 }
  0xc0   : > { %524 = shalt.err (!%p521_p4)
}
  0xc1   : > { %s525_s5 = scalar_lea.hbm %s749_s30, 128  ;;  %s529_s9 = scalar_lea.hbm %s801_s3, 256 }
  0xc2   : > { %p526_p10 = scmp.ne.s32.totalorder %s749_s30, %s525_s5  ;;  %p530_p2 = scmp.lt.u32.totalorder %s749_s30, %s801_s3 }
  0xc3   : > { %p531_p5 = scmp.lt.u32.totalorder %s529_s9, %s525_s5  ;;  %p533_p8 = scmp.lt.u32.totalorder %s525_s5, %s749_s30 }
  0xc4   : > { %p527_p12 = pnand %p526_p10, %p810_p11 }
  0xc5   : > { %p532_p9 = por %p531_p5, %p530_p2 }
  0xc6   : > { %p528_p1 = pneg %p527_p12 }
  0xc7   : > { %p534_p0 = por %p533_p8, %p532_p9 }
  0xc9   : > { %p535_p7 = pnand %p534_p0, %p528_p1 }
  0xcb   : > { %538 = shalt.err (!%p535_p7)
}
  0xcc   : > { %419 = dma.vmem_to_hbm [thread:$0]  (%p810_p11), %s751_s23, 128, %s749_s30, %s275_s4  }
  0xcd PF: > { %s302_s21 = sand.u32 1, %s573_s12   ;;  %p811_p13 = scmp.ne.s32.totalorder %s806_s27, 0 }
  0xce   : > { %p812_p3 = scmp.ge.s32.totalorder %s593_s17, 2  ;;  %s303_s24 = scalar_lea.sflag [#allocation4], %s302_s21 }
  0xd0   : > { %p426_p6 = pnand %p812_p3, %p811_p13 }
  0xd2   : > { %568 = dma.done.wait (!%p426_p6), %s303_s24, 128  }
  0xd3   : > { %570 = vsyncadd (!%p426_p6), %s303_s24, 4294967168  ;;  %s19_s17 = sadd.s32 1, %s593_s17   ;;  %s813_s12 = smov %s577_s13 }
  0xd4   : > { %p16_p4 = scmp.ge.s32.totalorder %s19_s17, 4   ;;  %s814_s13 = smov %s581_s14 }
  0xd5   : > { %s815_s14 = smov %s674_s26  ;;  %s816_s15 = smov %s589_s16 }
  0xd6   : > { %s817_s16 = smov %s819_s20  ;;  %18 = sbr.rel (!%p16_p4) target bundleno = 6 (0x6), region = 83 }
  0xdd   :  { %308 = vsyncpa [#allocation3], 1 }
  0xde   :  { %310 = vsyncpa [#allocation3 + $0x1], 1 }
  0xdf   :  { %311 = vsyncpa [#allocation4], 1 }
  0xe0   :  { %313 = vsyncpa [#allocation4 + $0x1], 1 }

</bundles_post_ra>
